<compile_context>
chip_gen: v7x
topology: tpu7x:2x2x1
jax: 0.10.0
libtpu: 0.0.40
codegen_flags: <defaults>
</compile_context>

<pallas_src>
import functools

import jax
import jax.numpy as jnp
from jax.experimental import pallas as pl
from jax.experimental.pallas import tpu as pltpu


def _custom_loss_kernel(pred_ref, labels_ref, out_ref, *, class_num, n_valid, mask_rows):
    """Per row-block partial reductions for the CustomLoss forward pass."""
    x = pred_ref[...].astype(jnp.float32)          # (bn, C) logits, f32 math
    labels = labels_ref[...]                       # (bn, 1) int32
    bn, C = x.shape

    # Row-stable softmax pieces without materializing p.
    m = jnp.max(x, axis=-1, keepdims=True)                       # (bn, 1)
    e = jnp.exp(x - m)                                           # full tile (EUP)
    s = jnp.sum(e, axis=-1, keepdims=True)                       # (bn, 1)
    inv_s = 1.0 / s                                              # per-row
    log_s = jnp.log(s)                                           # per-row

    class_ids = jax.lax.broadcasted_iota(jnp.int32, (bn, C), 1)

    # Gather the logit at the label column via a one-hot mask (no gather op).
    lab_mask = class_ids == labels                               # (bn, C)
    x_lab = jnp.sum(jnp.where(lab_mask, x, 0.0), axis=-1, keepdims=True)   # (bn, 1)
    p_lab = jnp.clip(jnp.exp(x_lab - m) * inv_s, 1e-7, 1.0)                # (bn, 1)

    # --- NL terms: (p_lab - 1) * log(clamp(1 - p_lab, 1e-7, 1)) ---
    nl_terms = (p_lab - 1.0) * jnp.log(jnp.clip(1.0 - p_lab, 1e-7, 1.0))

    # --- PL pieces ---
    # argmax(p) == argmax(x); first occurrence, computed in int32 (no full-tile convert).
    is_max = x == m
    pred_label_i = jnp.min(jnp.where(is_max, class_ids, C), axis=-1, keepdims=True)
    pred_label = pred_label_i.astype(jnp.float32)                # (bn, 1)

    # count of classes with p >= 1/C  <=>  x >= m + log(s) - log(C)
    thresh = m + log_s - jnp.log(jnp.float32(class_num))         # (bn, 1)
    count = jnp.sum(jnp.where(x < thresh, 0.0, 1.0), axis=-1, keepdims=True)
    conf = jnp.where(count < 2.0, 1.0, 0.0)                      # (bn, 1)
    d_max = inv_s * conf                                         # max_c(p * conf)
    wlog_terms = jnp.log(1.0 + d_max * d_max)                    # (bn, 1), >= 0

    pl_terms = pred_label * jnp.log(p_lab)                       # (bn, 1)

    if mask_rows:
        # Ragged last block: zero contributions of rows beyond the true batch.
        row_ids = (pl.program_id(0) * bn
                   + jax.lax.broadcasted_iota(jnp.int32, (bn, 1), 0))
        valid = row_ids < n_valid
        nl_terms = jnp.where(valid, nl_terms, 0.0)
        pl_terms = jnp.where(valid, pl_terms, 0.0)
        wlog_terms = jnp.where(valid, wlog_terms, 0.0)

    nl_sum = jnp.sum(nl_terms)
    pl_sum = jnp.sum(pl_terms)
    wlog_sum = jnp.sum(wlog_terms)

    # Pack the three partial scalars into a single (1, 8, 128) lane-dense block:
    # sublane 0 = NL partial, 1 = PL partial, 2 = log-weight partial.
    sub_ids = jax.lax.broadcasted_iota(jnp.int32, (8, 128), 0)
    packed = jnp.where(sub_ids == 0, nl_sum,
             jnp.where(sub_ids == 1, pl_sum,
             jnp.where(sub_ids == 2, wlog_sum, 0.0))).astype(jnp.float32)
    out_ref[...] = packed[None, :, :]


def _choose_block_n(n_rows, n_classes, itemsize):
    """Pick a row tile: ~4 MiB of f32 working tile, a multiple of the sublane pack,
    and >= 2 grid steps when there is enough work (v7x megacore).  Never falls back
    to one giant N-row block; ragged last blocks are masked in-kernel."""
    sub = 8 if itemsize >= 4 else (16 if itemsize == 2 else 32)
    if n_rows <= sub:
        return n_rows                               # block == full dim (always legal)
    target = max(sub, ((4 << 20) // max(1, n_classes * 4)) // sub * sub)
    n_ceil = -(-n_rows // sub) * sub                # n_rows rounded up to sublane pack
    block_n = min(target, n_ceil)
    if block_n >= n_ceil and n_ceil >= 2 * sub:
        # Would collapse to a single grid step: halve so both v7x TCs get work.
        block_n = -(-(n_ceil // 2) // sub) * sub
    return block_n


@functools.partial(jax.jit, static_argnames=("class_num", "param", "block_n"))
def custom_loss(y_pred, y_true2, *, class_num, param=0.01, block_n=None):
    """Pallas implementation of CustomLoss.forward.

    y_pred:  (N, C) float logits (any float dtype; streamed natively, f32 math inside)
    y_true2: (>=N,) integer labels in [0, class_num)
    Returns a shape-(1,) float32 score, matching the torch module.
    """
    N, C = y_pred.shape
    assert C == class_num, "y_pred class dim must equal class_num"

    labels = y_true2[:N].astype(jnp.int32).reshape(N, 1)

    itemsize = jnp.dtype(y_pred.dtype).itemsize
    if block_n is None:
        block_n = _choose_block_n(N, C, itemsize)

    grid_rows = pl.cdiv(N, block_n)
    needs_mask = (N % block_n) != 0

    # Scoped VMEM: double-buffered native input tile + a handful of f32 temporaries
    # (x, iota, one compare/select result) + headroom; capped below v7x's 64 MiB.
    tile_native = block_n * C * itemsize
    tile_f32 = block_n * C * 4
    vmem_limit = int(min(48 << 20, max(16 << 20, 2 * tile_native + 8 * tile_f32 + (2 << 20))))

    kernel = functools.partial(
        _custom_loss_kernel, class_num=C, n_valid=N, mask_rows=needs_mask
    )

    parts = pl.pallas_call(
        kernel,
        out_shape=jax.ShapeDtypeStruct((grid_rows, 8, 128), jnp.float32),
        grid_spec=pltpu.PrefetchScalarGridSpec(
            num_scalar_prefetch=0,
            grid=(grid_rows,),
            in_specs=[
                pl.BlockSpec((block_n, C), lambda i: (i, 0)),
                pl.BlockSpec((block_n, 1), lambda i: (i, 0)),
            ],
            out_specs=pl.BlockSpec((1, 8, 128), lambda i: (i, 0, 0)),
        ),
        compiler_params=pltpu.CompilerParams(
            dimension_semantics=("parallel",),
            vmem_limit_bytes=vmem_limit,
        ),
    )(y_pred, labels)

    # Tiny final reductions over the per-block partials (grid_rows elements each).
    nl_score = jnp.sum(parts[:, 0, 0]) / N
    pl_partial = jnp.sum(parts[:, 1, 0])
    weight = jnp.exp(jnp.sum(parts[:, 2, 0]))       # prod_i (1 + d_max_i^2)
    pl_score = -weight * pl_partial

    return jnp.reshape(nl_score + param * pl_score, (1,)).astype(jnp.float32)


def _reference_custom_loss(y_pred, y_true2, class_num, param=0.01):
    """Pure-JAX reference mirroring the PyTorch CustomLoss module."""
    B, C = y_pred.shape
    y_true = y_true2[:B]
    p = jax.nn.softmax(y_pred.astype(jnp.float32), axis=1)
    p = jnp.clip(p, 1e-7, 1.0)

    # NL
    p_lab = jnp.take_along_axis(p, y_true[:, None].astype(jnp.int32), axis=1)[:, 0]
    nl = jnp.sum((p_lab - 1.0) * jnp.log(jnp.clip(1.0 - p_lab, 1e-7, 1.0))) / B

    # PL
    th = jnp.float32(1.0 / class_num)
    count = jnp.sum(jnp.where(p < th, 0.0, 1.0), axis=1)
    conf = jnp.where(count < 2.0, 1.0, 0.0)
    D = p * conf[:, None]
    d_max = jnp.max(D, axis=1)
    weight = jnp.prod(1.0 + d_max * d_max)
    pred_label = jnp.argmax(p, axis=1).astype(jnp.float32)
    pl_score = -weight * jnp.sum(pred_label * jnp.log(p_lab))

    return jnp.reshape(nl + param * pl_score, (1,)).astype(jnp.float32)


if __name__ == "__main__":
    key = jax.random.PRNGKey(0)
    k1, k2, k3, k4 = jax.random.split(key, 4)

    # Test 1: small f32 case (batch divisible by the sublane pack).
    N, C = 8, 32
    param = 0.01
    y_pred = jax.random.normal(k1, (N, C), dtype=jnp.float32)
    y_true = jax.random.randint(k2, (N,), 0, C, dtype=jnp.int32)
    out = jax.block_until_ready(custom_loss(y_pred, y_true, class_num=C, param=param))
    ref = _reference_custom_loss(y_pred, y_true, class_num=C, param=param)
    assert jnp.allclose(out, ref, atol=1e-5, rtol=1e-4), (out, ref)

    # Test 2: ragged batch (exercises cdiv grid + in-kernel row masking, no padding copy).
    N2, C2 = 13, 32
    y_pred2 = jax.random.normal(k3, (N2, C2), dtype=jnp.float32)
    y_true2 = jax.random.randint(k4, (N2,), 0, C2, dtype=jnp.int32)
    out2 = jax.block_until_ready(custom_loss(y_pred2, y_true2, class_num=C2, param=param))
    ref2 = _reference_custom_loss(y_pred2, y_true2, class_num=C2, param=param)
    assert jnp.allclose(out2, ref2, atol=1e-5, rtol=1e-4), (out2, ref2)

    # Test 3: bf16 streaming path (inputs stay bf16 in HBM; f32 math in-kernel).
    y_pred_bf16 = y_pred.astype(jnp.bfloat16)
    out3 = jax.block_until_ready(custom_loss(y_pred_bf16, y_true, class_num=C, param=param))
    ref3 = _reference_custom_loss(y_pred_bf16, y_true, class_num=C, param=param)
    assert jnp.allclose(out3, ref3, atol=1e-4, rtol=1e-3), (out3, ref3)

    print("KERNEL_OK")
</pallas_src>

<mosaic_0001>
module attributes {stable_mosaic.version = 11 : i64} {
  func.func @_custom_loss_kernel(%arg0: i32, %arg1: memref<8x32xf32, #tpu.memory_space<vmem>>, %arg2: memref<8x1xi32, #tpu.memory_space<vmem>>, %arg3: memref<1x8x128xf32, #tpu.memory_space<vmem>>) attributes {dimension_semantics = [#tpu.dimension_semantics<parallel>], iteration_bounds = array<i64: 1>, scalar_prefetch = 0 : i64, scratch_operands = 0 : i64, tpu.core_type = #tpu.core_type<tc>, window_params = [{transform_indices = @transform_0, window_bounds = array<i64: 8, 32>}, {transform_indices = @transform_1, window_bounds = array<i64: 8, 1>}, {transform_indices = @transform_2, window_bounds = array<i64: 1, 8, 128>}]} {
    %c0 = arith.constant 0 : index
    %c0_0 = arith.constant 0 : index
    %0 = vector.load %arg1[%c0, %c0_0] : memref<8x32xf32, #tpu.memory_space<vmem>>, vector<8x32xf32>
    %c0_1 = arith.constant 0 : index
    %c0_2 = arith.constant 0 : index
    %1 = vector.load %arg2[%c0_1, %c0_2] : memref<8x1xi32, #tpu.memory_space<vmem>>, vector<8x1xi32>
    %cst = arith.constant dense<0xFF800000> : vector<8xf32>
    %2 = vector.multi_reduction <maximumf>, %0, %cst [1] : vector<8x32xf32> to vector<8xf32>
    %3 = vector.shape_cast %2 : vector<8xf32> to vector<8x1xf32>
    %4 = vector.broadcast %3 : vector<8x1xf32> to vector<8x32xf32>
    %5 = arith.subf %0, %4 : vector<8x32xf32>
    %6 = math.exp %5 : vector<8x32xf32>
    %cst_3 = arith.constant dense<0.000000e+00> : vector<8xf32>
    %7 = vector.multi_reduction <add>, %6, %cst_3 [1] : vector<8x32xf32> to vector<8xf32>
    %8 = vector.shape_cast %7 : vector<8xf32> to vector<8x1xf32>
    %cst_4 = arith.constant 1.000000e+00 : f32
    %9 = vector.broadcast %cst_4 : f32 to vector<8x1xf32>
    %10 = arith.divf %9, %8 : vector<8x1xf32>
    %11 = math.log %8 : vector<8x1xf32>
    %12 = tpu.iota {dimensions = array<i32: 1>} : vector<8x32xi32>
    %13 = vector.broadcast %1 : vector<8x1xi32> to vector<8x32xi32>
    %14 = arith.cmpi eq, %12, %13 : vector<8x32xi32>
    %cst_5 = arith.constant 0.000000e+00 : f32
    %15 = vector.broadcast %cst_5 : f32 to vector<8x32xf32>
    %16 = arith.select %14, %0, %15 : vector<8x32xi1>, vector<8x32xf32>
    %cst_6 = arith.constant dense<0.000000e+00> : vector<8xf32>
    %17 = vector.multi_reduction <add>, %16, %cst_6 [1] : vector<8x32xf32> to vector<8xf32>
    %18 = vector.shape_cast %17 : vector<8xf32> to vector<8x1xf32>
    %19 = arith.subf %18, %3 : vector<8x1xf32>
    %20 = math.exp %19 : vector<8x1xf32>
    %21 = arith.mulf %20, %10 : vector<8x1xf32>
    %cst_7 = arith.constant 1.000000e-07 : f32
    %cst_8 = arith.constant 1.000000e+00 : f32
    %22 = vector.broadcast %cst_7 : f32 to vector<8x1xf32>
    %23 = arith.maximumf %22, %21 : vector<8x1xf32>
    %24 = vector.broadcast %cst_8 : f32 to vector<8x1xf32>
    %25 = arith.minimumf %24, %23 : vector<8x1xf32>
    %cst_9 = arith.constant 1.000000e+00 : f32
    %26 = vector.broadcast %cst_9 : f32 to vector<8x1xf32>
    %27 = arith.subf %25, %26 : vector<8x1xf32>
    %cst_10 = arith.constant 1.000000e+00 : f32
    %28 = vector.broadcast %cst_10 : f32 to vector<8x1xf32>
    %29 = arith.subf %28, %25 : vector<8x1xf32>
    %cst_11 = arith.constant 1.000000e-07 : f32
    %cst_12 = arith.constant 1.000000e+00 : f32
    %30 = vector.broadcast %cst_11 : f32 to vector<8x1xf32>
    %31 = arith.maximumf %30, %29 : vector<8x1xf32>
    %32 = vector.broadcast %cst_12 : f32 to vector<8x1xf32>
    %33 = arith.minimumf %32, %31 : vector<8x1xf32>
    %34 = math.log %33 : vector<8x1xf32>
    %35 = arith.mulf %27, %34 : vector<8x1xf32>
    %36 = vector.broadcast %3 : vector<8x1xf32> to vector<8x32xf32>
    %37 = arith.cmpf oeq, %0, %36 : vector<8x32xf32>
    %c32_i32 = arith.constant 32 : i32
    %38 = vector.broadcast %c32_i32 : i32 to vector<8x32xi32>
    %39 = arith.select %37, %12, %38 : vector<8x32xi1>, vector<8x32xi32>
    %cst_13 = arith.constant dense<2147483647> : vector<8xi32>
    %40 = vector.multi_reduction <minsi>, %39, %cst_13 [1] : vector<8x32xi32> to vector<8xi32>
    %41 = vector.shape_cast %40 : vector<8xi32> to vector<8x1xi32>
    %42 = arith.sitofp %41 : vector<8x1xi32> to vector<8x1xf32>
    %43 = arith.addf %3, %11 : vector<8x1xf32>
    %cst_14 = arith.constant 3.200000e+01 : f32
    %44 = math.log %cst_14 : f32
    %45 = vector.broadcast %44 : f32 to vector<8x1xf32>
    %46 = arith.subf %43, %45 : vector<8x1xf32>
    %47 = vector.broadcast %46 : vector<8x1xf32> to vector<8x32xf32>
    %48 = arith.cmpf olt, %0, %47 : vector<8x32xf32>
    %cst_15 = arith.constant 0.000000e+00 : f32
    %cst_16 = arith.constant 1.000000e+00 : f32
    %49 = vector.broadcast %cst_15 : f32 to vector<8x32xf32>
    %50 = vector.broadcast %cst_16 : f32 to vector<8x32xf32>
    %51 = arith.select %48, %49, %50 : vector<8x32xi1>, vector<8x32xf32>
    %cst_17 = arith.constant dense<0.000000e+00> : vector<8xf32>
    %52 = vector.multi_reduction <add>, %51, %cst_17 [1] : vector<8x32xf32> to vector<8xf32>
    %53 = vector.shape_cast %52 : vector<8xf32> to vector<8x1xf32>
    %cst_18 = arith.constant 2.000000e+00 : f32
    %54 = vector.broadcast %cst_18 : f32 to vector<8x1xf32>
    %55 = arith.cmpf olt, %53, %54 : vector<8x1xf32>
    %cst_19 = arith.constant 1.000000e+00 : f32
    %cst_20 = arith.constant 0.000000e+00 : f32
    %56 = vector.broadcast %cst_19 : f32 to vector<8x1xf32>
    %57 = vector.broadcast %cst_20 : f32 to vector<8x1xf32>
    %58 = arith.select %55, %56, %57 : vector<8x1xi1>, vector<8x1xf32>
    %59 = arith.mulf %10, %58 : vector<8x1xf32>
    %60 = arith.mulf %59, %59 : vector<8x1xf32>
    %cst_21 = arith.constant 1.000000e+00 : f32
    %61 = vector.broadcast %cst_21 : f32 to vector<8x1xf32>
    %62 = arith.addf %61, %60 : vector<8x1xf32>
    %63 = math.log %62 : vector<8x1xf32>
    %64 = math.log %25 : vector<8x1xf32>
    %65 = arith.mulf %42, %64 : vector<8x1xf32>
    %66 = vector.shape_cast %35 : vector<8x1xf32> to vector<1x8x1xf32>
    %cst_22 = arith.constant dense<0.000000e+00> : vector<1xf32>
    %67 = vector.multi_reduction <add>, %66, %cst_22 [1, 2] : vector<1x8x1xf32> to vector<1xf32>
    %68 = vector.shape_cast %67 : vector<1xf32> to vector<1x1x1xf32>
    %69 = vector.extract %68[0, 0, 0] : f32 from vector<1x1x1xf32>
    %70 = vector.shape_cast %65 : vector<8x1xf32> to vector<1x8x1xf32>
    %cst_23 = arith.constant dense<0.000000e+00> : vector<1xf32>
    %71 = vector.multi_reduction <add>, %70, %cst_23 [1, 2] : vector<1x8x1xf32> to vector<1xf32>
    %72 = vector.shape_cast %71 : vector<1xf32> to vector<1x1x1xf32>
    %73 = vector.extract %72[0, 0, 0] : f32 from vector<1x1x1xf32>
    %74 = vector.shape_cast %63 : vector<8x1xf32> to vector<1x8x1xf32>
    %cst_24 = arith.constant dense<0.000000e+00> : vector<1xf32>
    %75 = vector.multi_reduction <add>, %74, %cst_24 [1, 2] : vector<1x8x1xf32> to vector<1xf32>
    %76 = vector.shape_cast %75 : vector<1xf32> to vector<1x1x1xf32>
    %77 = vector.extract %76[0, 0, 0] : f32 from vector<1x1x1xf32>
    %78 = tpu.iota {dimensions = array<i32: 0>} : vector<8x128xi32>
    %c0_i32 = arith.constant 0 : i32
    %79 = vector.broadcast %c0_i32 : i32 to vector<8x128xi32>
    %80 = arith.cmpi eq, %78, %79 : vector<8x128xi32>
    %c1_i32 = arith.constant 1 : i32
    %81 = vector.broadcast %c1_i32 : i32 to vector<8x128xi32>
    %82 = arith.cmpi eq, %78, %81 : vector<8x128xi32>
    %c2_i32 = arith.constant 2 : i32
    %83 = vector.broadcast %c2_i32 : i32 to vector<8x128xi32>
    %84 = arith.cmpi eq, %78, %83 : vector<8x128xi32>
    %cst_25 = arith.constant 0.000000e+00 : f32
    %85 = vector.broadcast %77 : f32 to vector<8x128xf32>
    %86 = vector.broadcast %cst_25 : f32 to vector<8x128xf32>
    %87 = arith.select %84, %85, %86 : vector<8x128xi1>, vector<8x128xf32>
    %88 = vector.broadcast %73 : f32 to vector<8x128xf32>
    %89 = arith.select %82, %88, %87 : vector<8x128xi1>, vector<8x128xf32>
    %90 = vector.broadcast %69 : f32 to vector<8x128xf32>
    %91 = arith.select %80, %90, %89 : vector<8x128xi1>, vector<8x128xf32>
    %92 = vector.shape_cast %91 : vector<8x128xf32> to vector<1x8x128xf32>
    %c0_26 = arith.constant 0 : index
    %c0_27 = arith.constant 0 : index
    %c0_28 = arith.constant 0 : index
    %93 = vector.load %arg3[%c0_26, %c0_27, %c0_28] : memref<1x8x128xf32, #tpu.memory_space<vmem>>, vector<1x8x128xf32>
    tpu.vector_store %arg3[%c0_26, %c0_27, %c0_28], %92 {strides = array<i32>} : memref<1x8x128xf32, #tpu.memory_space<vmem>>, vector<1x8x128xf32>,
    return
  }
  func.func @transform_0(%arg0: i32) -> (i32, i32) {
    %c0_i32 = arith.constant 0 : i32
    %c0_i32_0 = arith.constant 0 : i32
    return %arg0, %c0_i32 : i32, i32
  }
  func.func @transform_1(%arg0: i32) -> (i32, i32) {
    %c0_i32 = arith.constant 0 : i32
    %c0_i32_0 = arith.constant 0 : i32
    return %arg0, %c0_i32 : i32, i32
  }
  func.func @transform_2(%arg0: i32) -> (i32, i32, i32) {
    %c0_i32 = arith.constant 0 : i32
    %c0_i32_0 = arith.constant 0 : i32
    %c0_i32_1 = arith.constant 0 : i32
    return %arg0, %c0_i32, %c0_i32_0 : i32, i32, i32
  }
}

</mosaic_0001>

<bundles_post_ra>
// kernel: custom_loss.1
= control target key start
LH: loop header
LB: loop body
LE: loop exit
PB: predicated region body
PF: predicated region fallthrough
CT: control target
= control target key end

     0   :  { %vm13_vm0 = vcmask 261120   ;;  %v159_v1 = vmov 0   ;;  %v27_v4 = vlaneseq  ;;  %v160_v30 = vmov 1.0   ;;  %s196_s0 = inlined_call_operand.vmem [shape: f32[8,32], index: 0, kind: input, shape index: {}]   ;;  %s197_s1 = inlined_call_operand.vmem [shape: s32[8,1], index: 1, kind: input, shape index: {}]   ;;  %s198_s2 = inlined_call_operand.vmem [shape: f32[1,8,128], index: 2, kind: output, shape index: {}]  }
   0x1   :  { %v11_v0 = vld [vmem:[%s196_s0] sm:$0xff]  ;;  %143 = vset.pattern.permute.xlu1 %v159_v1  ;;  %144 = vset.pattern.permute.xlu0 %v159_v1  ;;  %vm85_vm5 = vcmask 7168   ;;  %v161_v48 = vmov 0.0  }
   0x2   :  { %v12_v2 = vld [vmem:[%s197_s1] sm:$0xff]  ;;  %v14_v3 = vsel %vm13_vm0, %v11_v0, -inf  ;;  %v28_v5 = vand.u32 127, %v27_v4 }
   0x3   :  { %30 = vperm.xlu1 %143, %v12_v2   ;;  %15 = vmax.xlane.f32.xlu0 %v14_v3 }
  0x82   :  { %v31_v13 = vpop.permute.xlu1 %30 }
  0x83   :  { %vm32_vm2 = vcmp.eq.s32.totalorder %v28_v5, %v31_v13 }
  0x84   :  { %v33_v15 = vsel %vm32_vm2, %v11_v0, 0.0 }
  0x85   :  { %v34_v17 = vsel %vm13_vm0, %v33_v15, 0.0 }
  0x90   :  { %v16_v6 = vpop.xlane.xlu0 %15 }
  0x91   :  { %v17_v7 = vsub.f32 %v11_v0, %v16_v6  ;;  %vm50_vm1 = vcmp.eq.f32.partialorder %v11_v0, %v16_v6 }
  0x92   :  { %v51_v8 = vsel %vm50_vm1, %v28_v5, 32 }
  0x93   :  { %v18_v9 = vmul.f32 1.442695, %v17_v7  ;;  %v52_v10 = vsel %vm13_vm0, %v51_v8, 2147483647 }
  0x94   :  { %v54_v11 = vshra.s32 %v52_v10, 16  ;;  %v53_v29 = vand.u32 65535, %v52_v10 }
  0x95   :  { %145 = vpow2.f32 %v18_v9 }
  0x96   :  { %v56_v12 = vcvt.s32.f32 %v54_v11  ;;  %v55_v35 = vcvt.s32.f32 %v53_v29 }
  0x98   :  { %57 = vmin.xlane.f32.xlu1 %v56_v12 }
  0x9f   :  { %v146_v14 = vpop.eup %145 }
  0xa0   :  { %v20_v16 = vsel %vm13_vm0, %v146_v14, 0.0 }
  0xa1   :  { %21 = vadd.xlane.f32.xlu0 %v20_v16 }
  0xa5   :  { %35 = vadd.xlane.f32.xlu0 %v34_v17 }
 0x125   :  { %v58_v28 = vpop.xlane.xlu1 %57 }
 0x126   :  { %vm59_vm4 = vcmp.eq.f32.partialorder %v56_v12, %v58_v28  ;;  %v64_v47 = vcvt.f32.s32 %v58_v28 }
 0x127   :  { %v60_v37 = vsel %vm59_vm4, %v55_v35, inf }
 0x128   :  { %v65_v52 = vshll.u32 %v64_v47, 16 }
 0x12e   :  { %v22_v18 = vpop.xlane.xlu0 %21 }
 0x12f   :  { %147 = vlog2.f32 %v22_v18 }
 0x130   :  { %149 = vrcp.f32 %v22_v18 }
 0x132   :  { %v36_v19 = vpop.xlane.xlu0 %35 }
 0x133   :  { %v37_v20 = vsub.f32 %v36_v19, %v16_v6 }
 0x135   :  { %v38_v21 = vmul.f32 1.442695, %v37_v20 }
 0x137   :  { %151 = vpow2.f32 %v38_v21 }
 0x139   :  { %v148_v22 = vpop.eup %147 }
 0x13a   :  { %v26_v23 = vmul.f32 0.6931472, %v148_v22  ;;  %v150_v26 = vpop.eup %149 }
 0x13c   :  { %v68_v24 = vadd.f32 %v26_v23, %v16_v6  ;;  %v117_v23 = vshrl.u32 %v27_v4, 7 }
 0x13e   :  { %v133_v25 = vadd.f32 -3.465736, %v68_v24  ;;  %vm120_vm7 = vcmp.eq.s32.totalorder %v117_v23, 2  ;;  %vm119_vm8 = vcmp.eq.s32.totalorder %v117_v23, 1  ;;  %vm118_vm9 = vcmp.eq.s32.totalorder %v117_v23, 0 }
 0x140   :  { %vm70_vm3 = vcmp.lt.f32.partialorder %v11_v0, %v133_v25 }
 0x141   :  { %v152_v27 = vpop.eup %151  ;;  %v71_v31 = vsel %vm70_vm3, 0.0, %v160_v30 }
 0x142   :  { %v40_v32 = vmul.f32 %v152_v27, %v150_v26  ;;  %v72_v33 = vsel %vm13_vm0, %v71_v31, 0.0 }
 0x143   :  { %73 = vadd.xlane.f32.xlu0 %v72_v33 }
 0x144   :  { %v41_v34 = vmax.f32 %v40_v32, 1e-07 }
 0x146   :  { %v42_v36 = vmin.f32 %v41_v34, 1.0 }
 0x147   :  { %61 = vmin.xlane.f32.xlu0 %v60_v37 }
 0x148   :  { %v44_v38 = vsub.f32 1.0, %v42_v36  ;;  %v132_v42 = vadd.f32 -1.0, %v42_v36 }
 0x14a   :  { %v45_v39 = vmax.f32 %v44_v38, 1e-07 }
 0x14c   :  { %v46_v40 = vmin.f32 %v45_v39, 1.0 }
 0x14e   :  { %153 = vlog2.f32 %v46_v40 }
 0x14f   :  { %155 = vlog2.f32 %v42_v36 }
 0x158   :  { %v154_v41 = vpop.eup %153 }
 0x159   :  { %v48_v43 = vmul.f32 0.6931472, %v154_v41  ;;  %v156_v55 = vpop.eup %155 }
 0x15a   :  { %v83_v59 = vmul.f32 0.6931472, %v156_v55 }
 0x15b   :  { %v49_v44 = vmul.f32 %v132_v42, %v48_v43 }
 0x15d   :  { %v86_v45 = vsel %vm85_vm5, %v49_v44, 0.0 }
 0x15e   :  { %87 = vadd.xlane.f32.xlu0 %v86_v45 }
 0x1d0   :  { %v74_v46 = vpop.xlane.xlu0 %73 }
 0x1d1   :  { %vm75_vm6 = vcmp.lt.f32.partialorder %v74_v46, 2.0 }
 0x1d2   :  { %v76_v49 = vsel %vm75_vm6, 1.0, %v161_v48 }
 0x1d3   :  { %v77_v50 = vmul.f32 %v150_v26, %v76_v49 }
 0x1d4   :  { %v62_v51 = vpop.xlane.xlu0 %61 }
 0x1d5   :  { %v78_v53 = vmul.f32 %v77_v50, %v77_v50  ;;  %v63_v54 = vcvt.f32.s32 %v62_v51 }
 0x1d7   :  { %v79_v56 = vadd.f32 1.0, %v78_v53  ;;  %v66_v57 = vadd.s32 %v65_v52, %v63_v54 }
 0x1d9   :  { %157 = vlog2.f32 %v79_v56  ;;  %v67_v58 = vcvt.s32.f32 %v66_v57 }
 0x1db   :  { %v84_v60 = vmul.f32 %v83_v59, %v67_v58 }
 0x1dd   :  { %v96_v61 = vsel %vm85_vm5, %v84_v60, 0.0 }
 0x1de   :  { %97 = vadd.xlane.f32.xlu0 %v96_v61 }
 0x1e3   :  { %v158_v62 = vpop.eup %157 }
 0x1e4   :  { %v81_v63 = vmul.f32 0.6931472, %v158_v62 }
 0x1e6   :  { %v106_v0 = vsel %vm85_vm5, %v81_v63, 0.0 }
 0x1e7   :  { %107 = vadd.xlane.f32.xlu0 %v106_v0 }
 0x1eb   :  { %v88_v1 = vpop.xlane.xlu0 %87 }
 0x1ec   :  { %v89_v2 = vrot.slane %v88_v1, 4 }
 0x1ee   :  { %v90_v3 = vadd.f32 %v89_v2, %v88_v1 }
 0x1f0   :  { %v91_v5 = vrot.slane %v90_v3, 2 }
 0x1f2   :  { %v92_v6 = vadd.f32 %v91_v5, %v90_v3 }
 0x1f4   :  { %v93_v7 = vrot.slane %v92_v6, 1 }
 0x1f6   :  { %v94_v8 = vadd.f32 %v93_v7, %v92_v6 }
 0x1f8   :  { %134 = vpush %v94_v8 }
 0x229   :  { %s135_s0 = spop %134 }
 0x22a   :  { %v125_v27 = vstv %s135_s0 }
 0x26b   :  { %v98_v9 = vpop.xlane.xlu0 %97 }
 0x26c   :  { %v99_v10 = vrot.slane %v98_v9, 4 }
 0x26e   :  { %v100_v11 = vadd.f32 %v99_v10, %v98_v9 }
 0x270   :  { %v101_v12 = vrot.slane %v100_v11, 2 }
 0x272   :  { %v102_v13 = vadd.f32 %v101_v12, %v100_v11 }
 0x274   :  { %v108_v14 = vpop.xlane.xlu0 %107  ;;  %v103_v15 = vrot.slane %v102_v13, 1 }
 0x275   :  { %v109_v16 = vrot.slane %v108_v14, 4 }
 0x276   :  { %v104_v17 = vadd.f32 %v103_v15, %v102_v13 }
 0x277   :  { %v110_v18 = vadd.f32 %v109_v16, %v108_v14 }
 0x278   :  { %136 = vpush %v104_v17 }
 0x279   :  { %v111_v19 = vrot.slane %v110_v18, 2 }
 0x27b   :  { %v112_v20 = vadd.f32 %v111_v19, %v110_v18 }
 0x27d   :  { %v113_v21 = vrot.slane %v112_v20, 1 }
 0x27f   :  { %v114_v22 = vadd.f32 %v113_v21, %v112_v20 }
 0x281   :  { %138 = vpush %v114_v22 }
 0x2a9   :  { %s137_s1 = spop %136 }
 0x2aa   :  { %v123_v25 = vstv %s137_s1 }
 0x2b2   :  { %s139_s13 = spop %138 }
 0x2b3   :  { %v121_v24 = vstv %s139_s13 }
 0x2b4   :  { %v122_v26 = vsel %vm120_vm7, %v121_v24, 0.0 }
 0x2b5   :  { %v124_v28 = vsel %vm119_vm8, %v123_v25, %v122_v26 }
 0x2b6   :  { %v126_v29 = vsel %vm118_vm9, %v125_v27, %v124_v28 }
 0x2b7   :  { %127 = vst [vmem:[%s198_s2] sm:$0xff] %v126_v29 }

</bundles_post_ra>
